<compile_context>
chip_gen: v7x
topology: tpu7x:2x2x1
jax: 0.10.0
libtpu: 0.0.40
codegen_flags: <defaults>
</compile_context>

<pallas_src>
import functools

import jax
import jax.numpy as jnp
from jax.experimental import pallas as pl
from jax.experimental.pallas import tpu as pltpu

# Keep matmul precision identical between the Pallas kernels and the JAX
# reference so the correctness check is tight.
jax.config.update("jax_default_matmul_precision", "highest")


# ---------------------------------------------------------------------------
# Pallas kernels
# ---------------------------------------------------------------------------

def _pointwise_kernel(x_ref, w_ref, b_ref, o_ref):
    """Fused 1x1 conv (+ folded BN) + SiLU.  x_ref: (TM, Cin), w_ref: (Cin, Cout)."""
    acc = jnp.dot(x_ref[...], w_ref[...], preferred_element_type=jnp.float32)
    acc = acc + b_ref[...]
    acc = acc * jax.nn.sigmoid(acc)            # SiLU
    o_ref[...] = acc.astype(o_ref.dtype)


def _pointwise_concat_kernel(x1_ref, x2_ref, w1_ref, w2_ref, b_ref, o_ref):
    """cv3: 1x1 conv over channel-concat(x1, x2) without materializing the concat."""
    acc = jnp.dot(x1_ref[...], w1_ref[...], preferred_element_type=jnp.float32)
    acc = acc + jnp.dot(x2_ref[...], w2_ref[...], preferred_element_type=jnp.float32)
    acc = acc + b_ref[...]
    acc = acc * jax.nn.sigmoid(acc)            # SiLU
    o_ref[...] = acc.astype(o_ref.dtype)


def _conv3x3_kernel(*refs, add_residual: bool):
    """Fused 3x3 conv (stride 1, pad 1, folded BN) + SiLU (+ optional residual).

    Channels-last: x_ref (H, W, Cin), w_ref (3, 3, Cin, Cout), o_ref (H, W, Cout).
    Zero padding is done entirely in VMEM (xpad_ref); HBM sees unpadded data.
    """
    if add_residual:
        x_ref, w_ref, b_ref, res_ref, o_ref, xpad_ref = refs
    else:
        x_ref, w_ref, b_ref, o_ref, xpad_ref = refs
        res_ref = None

    H, W, Cin = x_ref.shape
    Cout = o_ref.shape[-1]

    # In-kernel zero padding: zero the (H+2, W+2, Cin) scratch, copy interior.
    xpad_ref[...] = jnp.zeros_like(xpad_ref)
    xpad_ref[1:H + 1, 1:W + 1, :] = x_ref[...].astype(xpad_ref.dtype)

    # 3x3 conv as 9 shifted MXU matmuls; shifts are sublane/outer-axis slices only.
    acc = None
    for di in range(3):
        for dj in range(3):
            win = xpad_ref[di:di + H, dj:dj + W, :].reshape(H * W, Cin)
            part = jnp.dot(win, w_ref[di, dj], preferred_element_type=jnp.float32)
            acc = part if acc is None else acc + part

    acc = acc + b_ref[...]
    acc = acc * jax.nn.sigmoid(acc)            # SiLU (applied before the shortcut add)
    if res_ref is not None:                    # bottleneck shortcut: x + cv2(cv1(x))
        acc = acc + res_ref[...].reshape(H * W, Cout).astype(jnp.float32)
    o_ref[...] = acc.reshape(H, W, Cout).astype(o_ref.dtype)


# ---------------------------------------------------------------------------
# pallas_call wrappers
# ---------------------------------------------------------------------------

def _pick_row_tile(m: int) -> int:
    # Coarse tiles amortize the ~0.35 us/step pipeline overhead; keep >= 2 grid
    # steps so both TensorCores on v7x get work; keep the sublane dim 8-aligned.
    for t in (2048, 1024, 512, 256, 128, 64, 32, 16, 8):
        if m % t == 0 and m // t >= 2:
            return t
    return m


def _pointwise_conv_silu(x_flat, w, b):
    m, cin = x_flat.shape
    cout = w.shape[1]
    tm = _pick_row_tile(m)
    return pl.pallas_call(
        _pointwise_kernel,
        out_shape=jax.ShapeDtypeStruct((m, cout), x_flat.dtype),
        grid=(m // tm,),
        in_specs=[
            pl.BlockSpec((tm, cin), lambda i: (i, 0)),
            pl.BlockSpec((cin, cout), lambda i: (0, 0)),
            pl.BlockSpec((1, cout), lambda i: (0, 0)),
        ],
        out_specs=pl.BlockSpec((tm, cout), lambda i: (i, 0)),
        compiler_params=pltpu.CompilerParams(dimension_semantics=("parallel",)),
    )(x_flat, w, b.reshape(1, cout))


def _pointwise_concat_conv_silu(x1, x2, w1, w2, b):
    m, c1 = x1.shape
    c2 = x2.shape[1]
    cout = w1.shape[1]
    tm = _pick_row_tile(m)
    return pl.pallas_call(
        _pointwise_concat_kernel,
        out_shape=jax.ShapeDtypeStruct((m, cout), x1.dtype),
        grid=(m // tm,),
        in_specs=[
            pl.BlockSpec((tm, c1), lambda i: (i, 0)),
            pl.BlockSpec((tm, c2), lambda i: (i, 0)),
            pl.BlockSpec((c1, cout), lambda i: (0, 0)),
            pl.BlockSpec((c2, cout), lambda i: (0, 0)),
            pl.BlockSpec((1, cout), lambda i: (0, 0)),
        ],
        out_specs=pl.BlockSpec((tm, cout), lambda i: (i, 0)),
        compiler_params=pltpu.CompilerParams(dimension_semantics=("parallel",)),
    )(x1, x2, w1, w2, b.reshape(1, cout))


def _conv3x3_silu(x_nhwc, w, b, residual=None):
    n, h, wd, cin = x_nhwc.shape
    cout = w.shape[-1]
    add_res = residual is not None
    kernel = functools.partial(_conv3x3_kernel, add_residual=add_res)

    in_specs = [
        pl.BlockSpec((None, h, wd, cin), lambda i: (i, 0, 0, 0)),
        pl.BlockSpec((3, 3, cin, cout), lambda i: (0, 0, 0, 0)),
        pl.BlockSpec((1, cout), lambda i: (0, 0)),
    ]
    args = [x_nhwc, w, b.reshape(1, cout)]
    if add_res:
        in_specs.append(pl.BlockSpec((None, h, wd, cout), lambda i: (i, 0, 0, 0)))
        args.append(residual)

    return pl.pallas_call(
        kernel,
        out_shape=jax.ShapeDtypeStruct((n, h, wd, cout), x_nhwc.dtype),
        grid=(n,),
        in_specs=in_specs,
        out_specs=pl.BlockSpec((None, h, wd, cout), lambda i: (i, 0, 0, 0)),
        scratch_shapes=[pltpu.VMEM((h + 2, wd + 2, cin), jnp.float32)],
        compiler_params=pltpu.CompilerParams(dimension_semantics=("parallel",)),
    )(*args)


# ---------------------------------------------------------------------------
# Parameter construction: random conv weights + BN params, folded to scale/bias
# (inference / eval-mode BatchNorm), stored channels-last (HWIO / IO).
# ---------------------------------------------------------------------------

_BN_EPS = 1e-5


def _fold_conv_bn(key, cin, cout, k):
    kw, kb = jax.random.split(key)
    w = jax.random.normal(kw, (k, k, cin, cout), jnp.float32) / float((cin * k * k) ** 0.5)
    k1, k2, k3, k4 = jax.random.split(kb, 4)
    gamma = jax.random.uniform(k1, (cout,), jnp.float32, 0.5, 1.5)
    beta = jax.random.normal(k2, (cout,), jnp.float32) * 0.1
    mean = jax.random.normal(k3, (cout,), jnp.float32) * 0.1
    var = jax.random.uniform(k4, (cout,), jnp.float32, 0.5, 1.5)
    scale = gamma / jnp.sqrt(var + _BN_EPS)
    return w * scale, beta - mean * scale          # folded weight, folded bias


def _fold_repconvn(key, cin, cout):
    # RepConvN(training forward) = SiLU(BN3(conv3x3(x)) + BN1(conv1x1(x)))
    # == SiLU(conv3x3_eq(x) + b_eq) with the 1x1 branch padded into the center tap.
    k3, k1 = jax.random.split(key)
    w3, b3 = _fold_conv_bn(k3, cin, cout, 3)
    w1, b1 = _fold_conv_bn(k1, cin, cout, 1)
    w_eq = w3.at[1:2, 1:2].add(w1)
    return w_eq, b3 + b1


def make_repncsp_params(key, c1, c2, n=1, shortcut=True, e=0.5):
    c_ = int(c2 * e)
    keys = jax.random.split(key, 3 + n)
    cv1_w, cv1_b = _fold_conv_bn(keys[0], c1, c_, 1)
    cv2_w, cv2_b = _fold_conv_bn(keys[1], c1, c_, 1)
    cv3_w, cv3_b = _fold_conv_bn(keys[2], 2 * c_, c2, 1)
    bottlenecks = []
    for i in range(n):
        kb1, kb2 = jax.random.split(keys[3 + i])
        rep_w, rep_b = _fold_repconvn(kb1, c_, c_)       # RepNBottleneck uses e=1.0
        bw, bb = _fold_conv_bn(kb2, c_, c_, 3)
        bottlenecks.append({
            "rep_w": rep_w, "rep_b": rep_b,
            "cv2_w": bw, "cv2_b": bb,
            "add": bool(shortcut),                       # c1 == c2 == c_ inside block
        })
    return {
        "cv1_w": cv1_w.reshape(c1, c_), "cv1_b": cv1_b,
        "cv2_w": cv2_w.reshape(c1, c_), "cv2_b": cv2_b,
        "cv3_w": cv3_w.reshape(2 * c_, c2), "cv3_b": cv3_b,
        "bottlenecks": bottlenecks,
    }


# ---------------------------------------------------------------------------
# RepNCSP forward built from the Pallas kernels (NCHW in / NCHW out)
# ---------------------------------------------------------------------------

def repncsp_forward(x_nchw, params):
    n, c1, h, wd = x_nchw.shape
    c_ = params["cv1_w"].shape[1]
    c2 = params["cv3_w"].shape[1]
    m = n * h * wd

    x = jnp.transpose(x_nchw, (0, 2, 3, 1))              # NHWC: lane-dense channels
    xf = x.reshape(m, c1)

    y1 = _pointwise_conv_silu(xf, params["cv1_w"], params["cv1_b"])   # cv1
    y2 = _pointwise_conv_silu(xf, params["cv2_w"], params["cv2_b"])   # cv2

    y1 = y1.reshape(n, h, wd, c_)
    for blk in params["bottlenecks"]:                    # self.m (RepNBottleneck chain)
        t = _conv3x3_silu(y1, blk["rep_w"], blk["rep_b"])              # RepConvN (fused)
        y1 = _conv3x3_silu(t, blk["cv2_w"], blk["cv2_b"],
                           residual=y1 if blk["add"] else None)        # Conv3x3 + shortcut

    # cv3 over concat(m(cv1(x)), cv2(x)) — concat fused into the kernel.
    w1, w2 = params["cv3_w"][:c_], params["cv3_w"][c_:]
    out = _pointwise_concat_conv_silu(y1.reshape(m, c_), y2, w1, w2, params["cv3_b"])
    return jnp.transpose(out.reshape(n, h, wd, c2), (0, 3, 1, 2))


# ---------------------------------------------------------------------------
# Pure-JAX reference (same eval-mode semantics) for the correctness check
# ---------------------------------------------------------------------------

def _ref_pw_silu(x, w, b):
    y = jnp.einsum("...c,cd->...d", x, w) + b
    return y * jax.nn.sigmoid(y)


def _ref_conv3x3_silu(x, w, b):
    y = jax.lax.conv_general_dilated(
        x, w, window_strides=(1, 1), padding=((1, 1), (1, 1)),
        dimension_numbers=("NHWC", "HWIO", "NHWC"))
    y = y + b
    return y * jax.nn.sigmoid(y)


def repncsp_reference(x_nchw, params):
    x = jnp.transpose(x_nchw, (0, 2, 3, 1))
    y1 = _ref_pw_silu(x, params["cv1_w"], params["cv1_b"])
    y2 = _ref_pw_silu(x, params["cv2_w"], params["cv2_b"])
    for blk in params["bottlenecks"]:
        t = _ref_conv3x3_silu(y1, blk["rep_w"], blk["rep_b"])
        t = _ref_conv3x3_silu(t, blk["cv2_w"], blk["cv2_b"])
        y1 = y1 + t if blk["add"] else t
    cat = jnp.concatenate([y1, y2], axis=-1)
    out = _ref_pw_silu(cat, params["cv3_w"], params["cv3_b"])
    return jnp.transpose(out, (0, 3, 1, 2))


# ---------------------------------------------------------------------------

if __name__ == "__main__":
    key = jax.random.PRNGKey(0)
    kx, kp = jax.random.split(key)

    # Small shapes consistent with the module (NCHW input).
    N, C1, C2, H, W = 2, 16, 16, 16, 16
    x = jax.random.normal(kx, (N, C1, H, W), dtype=jnp.float32)
    params = make_repncsp_params(kp, C1, C2, n=1, shortcut=True, e=0.5)

    y = repncsp_forward(x, params)
    y = jax.block_until_ready(y)

    ref = repncsp_reference(x, params)
    assert y.shape == (N, C2, H, W)
    assert jnp.allclose(y, ref, atol=2e-2, rtol=2e-2), (
        "Pallas RepNCSP mismatch vs reference; max abs diff = "
        f"{float(jnp.max(jnp.abs(y - ref)))}"
    )

    print("KERNEL_OK")
</pallas_src>

<mosaic_0001>
module attributes {stable_mosaic.version = 11 : i64} {
  func.func @_pointwise_kernel(%arg0: i32, %arg1: memref<256x16xf32, #tpu.memory_space<vmem>>, %arg2: memref<16x8xf32, #tpu.memory_space<vmem>>, %arg3: memref<1x8xf32, #tpu.memory_space<vmem>>, %arg4: memref<256x8xf32, #tpu.memory_space<vmem>>) attributes {dimension_semantics = [#tpu.dimension_semantics<parallel>], iteration_bounds = array<i64: 2>, scalar_prefetch = 0 : i64, scratch_operands = 0 : i64, tpu.core_type = #tpu.core_type<tc>, window_params = [{transform_indices = @transform_0, window_bounds = array<i64: 256, 16>}, {pipeline_mode = #tpu.pipeline_mode<synchronous>, transform_indices = @transform_1, window_bounds = array<i64: 16, 8>}, {pipeline_mode = #tpu.pipeline_mode<synchronous>, transform_indices = @transform_2, window_bounds = array<i64: 1, 8>}, {transform_indices = @transform_3, window_bounds = array<i64: 256, 8>}]} {
    %c0 = arith.constant 0 : index
    %c0_0 = arith.constant 0 : index
    %0 = vector.load %arg1[%c0, %c0_0] : memref<256x16xf32, #tpu.memory_space<vmem>>, vector<256x16xf32>
    %c0_1 = arith.constant 0 : index
    %c0_2 = arith.constant 0 : index
    %1 = vector.load %arg2[%c0_1, %c0_2] : memref<16x8xf32, #tpu.memory_space<vmem>>, vector<16x8xf32>
    %cst = arith.constant dense<0.000000e+00> : vector<256x8xf32>
    %2 = tpu.matmul %0, %1, %cst {dimension_numbers = #tpu.dot_dimension_numbers<[1], [0], [0], [1], [0, 0, 1, 1], [], []>, precision = #tpu.contract_precision<fp32>} : vector<256x16xf32>, vector<16x8xf32>, vector<256x8xf32> -> vector<256x8xf32>
    %c0_3 = arith.constant 0 : index
    %c0_4 = arith.constant 0 : index
    %3 = vector.load %arg3[%c0_3, %c0_4] : memref<1x8xf32, #tpu.memory_space<vmem>>, vector<1x8xf32>
    %4 = vector.broadcast %3 : vector<1x8xf32> to vector<256x8xf32>
    %5 = arith.addf %2, %4 : vector<256x8xf32>
    %6 = arith.negf %5 : vector<256x8xf32>
    %7 = math.exp %6 : vector<256x8xf32>
    %cst_5 = arith.constant 1.000000e+00 : f32
    %8 = vector.broadcast %cst_5 : f32 to vector<256x8xf32>
    %9 = arith.addf %8, %7 : vector<256x8xf32>
    %10 = arith.divf %8, %9 : vector<256x8xf32>
    %11 = arith.mulf %5, %10 : vector<256x8xf32>
    %c0_6 = arith.constant 0 : index
    %c0_7 = arith.constant 0 : index
    %12 = vector.load %arg4[%c0_6, %c0_7] : memref<256x8xf32, #tpu.memory_space<vmem>>, vector<256x8xf32>
    tpu.vector_store %arg4[%c0_6, %c0_7], %11 {strides = array<i32>} : memref<256x8xf32, #tpu.memory_space<vmem>>, vector<256x8xf32>,
    return
  }
  func.func @transform_0(%arg0: i32) -> (i32, i32) {
    %c0_i32 = arith.constant 0 : i32
    %c0_i32_0 = arith.constant 0 : i32
    return %arg0, %c0_i32 : i32, i32
  }
  func.func @transform_1(%arg0: i32) -> (i32, i32) {
    %c0_i32 = arith.constant 0 : i32
    %c0_i32_0 = arith.constant 0 : i32
    %c0_i32_1 = arith.constant 0 : i32
    return %c0_i32, %c0_i32_0 : i32, i32
  }
  func.func @transform_2(%arg0: i32) -> (i32, i32) {
    %c0_i32 = arith.constant 0 : i32
    %c0_i32_0 = arith.constant 0 : i32
    %c0_i32_1 = arith.constant 0 : i32
    return %c0_i32, %c0_i32_0 : i32, i32
  }
  func.func @transform_3(%arg0: i32) -> (i32, i32) {
    %c0_i32 = arith.constant 0 : i32
    %c0_i32_0 = arith.constant 0 : i32
    return %arg0, %c0_i32 : i32, i32
  }
}

</mosaic_0001>

<bundles_post_ra>
// kernel: tpu_custom_call.1
= control target key start
LH: loop header
LB: loop body
LE: loop exit
PB: predicated region body
PF: predicated region fallthrough
CT: control target
= control target key end

     0   :  { %s3357_s12 = smov 0   ;;  %s4048_s0 = inlined_call_operand.vmem [shape: f32[512,16], index: 0, kind: input, shape index: {}]   ;;  %s4049_s1 = inlined_call_operand.vmem [shape: f32[16,8], index: 1, kind: input, shape index: {}]   ;;  %s4050_s2 = inlined_call_operand.vmem [shape: f32[1,8], index: 2, kind: input, shape index: {}]   ;;  %s4051_s3 = inlined_call_operand.vmem [shape: f32[512,8], index: 3, kind: output, shape index: {}]  }
   0x1 LB: > { %s2417_s13 = sadd.s32 4294967295, %s3335_s12   ;;  %p2421_p0 = scmp.ge.s32.totalorder %s3335_s12, 1  ;;  %s3335_s12 = sphi %s3357_s12, %s13_s12  }
   0x2   : > { %p138_p1 = scmp.lt.s32.totalorder %s3335_s12, 3 }
   0x4   : > { %p139_p2 = pnand %p2421_p0, %p138_p1 }
   0x6   : > { %142 = sbr.rel (%p139_p2) target bundleno = 470 (0x1d6), region = 32 }
   0xd   : > { %v206_v0 = vld [vmem:[%s4049_s1] sm:$0xff]  ;;  %v207_v1 = vld [vmem:[%s4049_s1 + $0x8] sm:$0xff]  ;;  %s2422_s18 = sshll.u32 %s2417_s13, 5  ;;  %vm215_vm0 = vcmask 130048   ;;  %vm2328_vm1 = vcmask 64512  }
   0xe   : > { %v313_v2 = vand.u32 4294901760, %v206_v0  ;;  %v316_v3 = vand.u32 4294901760, %v207_v1  ;;  %p163_p3 = scmp.lt.s32.totalorder %s2422_s18, 63 }
  0x10   : > { %v3371_v4 = vpack.c.bf16 %v316_v3, %v313_v2  ;;  %s4107_s18 = smov (!%p163_p3, %s2422_s18), 63  ;;  %v701_v5 = vsub.f32 %v206_v0, %v313_v2  ;;  %v708_v6 = vsub.f32 %v207_v1, %v316_v3 }
  0x11   : > { %s2423_s19 = sshll.u32 %s4107_s18, 3 }
  0x12   : > { %2990 = vmatprep.subr.bf16.mxu0 %v3371_v4  ;;  %2978 = vmatprep.subr.bf16.mxu1 %v3371_v4  ;;  %v702_v7 = vand.u32 4294901760, %v701_v5  ;;  %v709_v8 = vand.u32 4294901760, %v708_v6  ;;  %s3384_s22 = scalar_lea.vmem %s4048_s0, %s2423_s19  ;;  %v3396_v21 = vpack.c.bf16 %v708_v6, %v701_v5  ;;  %s3875_s27 = scalar_lea.vmem %s4051_s3, %s2423_s19 }
  0x13   : > { %2992 = vmatpush3.bf16.msra.mxu0 %v3371_v4  ;;  %2980 = vmatpush3.bf16.msra.mxu1 %v3371_v4  ;;  %v174_v9 = vld [vmem:[%s3384_s22] sm:$0xff]  ;;  %v175_v10 = vld [vmem:[%s3384_s22 + $0x8] sm:$0xff]  ;;  %v176_v13 = vld [vmem:[%s3384_s22 + $0x10] sm:$0xff] }
  0x14   : > { %v703_v11 = vsub.f32 %v701_v5, %v702_v7  ;;  %v710_v12 = vsub.f32 %v708_v6, %v709_v8  ;;  %v2993_v14 = vpack.c.bf16 %v709_v8, %v702_v7  ;;  %v217_v15 = vsel %vm215_vm0, %v174_v9, 0  ;;  %v177_v18 = vld [vmem:[%s3384_s22 + $0x18] sm:$0xff]  ;;  %v178_v19 = vld [vmem:[%s3384_s22 + $0x20] sm:$0xff]  ;;  %v179_v20 = vld [vmem:[%s3384_s22 + $0x28] sm:$0xff] }
  0x15   : > { %v220_v16 = vsel %vm215_vm0, %v175_v10, 0  ;;  %v223_v17 = vsel %vm215_vm0, %v176_v13, 0  ;;  %v3398_v22 = vand.u32 4294901760, %v217_v15  ;;  %v180_v26 = vld [vmem:[%s3384_s22 + $0x30] sm:$0xff]  ;;  %v226_v28 = vsel %vm215_vm0, %v177_v18, 0  ;;  %v181_v35 = vld [vmem:[%s3384_s22 + $0x38] sm:$0xff] }
  0x16   : > { %v3400_v23 = vand.u32 4294901760, %v220_v16  ;;  %v704_v24 = vand.u32 4294901760, %v703_v11  ;;  %v711_v25 = vand.u32 4294901760, %v710_v12  ;;  %2994 = vmatprep.subr.bf16.mxu0 %v2993_v14  ;;  %v3403_v27 = vand.u32 4294901760, %v223_v17  ;;  %v182_v56 = vld [vmem:[%s3384_s22 + $0x40] sm:$0xff]  ;;  %v183_v57 = vld [vmem:[%s3384_s22 + $0x48] sm:$0xff] }
  0x17   : > { %v229_v29 = vsel %vm215_vm0, %v178_v19, 0  ;;  %v232_v30 = vsel %vm215_vm0, %v179_v20, 0  ;;  %v3409_v31 = vsub.f32 %v217_v15, %v3398_v22  ;;  %v3414_v34 = vand.u32 4294901760, %v226_v28  ;;  %v184_v2 = vld [vmem:[%s3384_s22 + $0x50] sm:$0xff]  ;;  %v185_v3 = vld [vmem:[%s3384_s22 + $0x58] sm:$0xff]  ;;  %v186_v8 = vld [vmem:[%s3384_s22 + $0x60] sm:$0xff] }
  0x18   : > { %v3412_v32 = vsub.f32 %v220_v16, %v3400_v23  ;;  %v2981_v33 = vpack.c.bf16 %v711_v25, %v704_v24  ;;  %v3418_v36 = vsub.f32 %v223_v17, %v3403_v27  ;;  %v3420_v37 = vand.u32 4294901760, %v229_v29  ;;  %v187_v13 = vld [vmem:[%s3384_s22 + $0x68] sm:$0xff] }
  0x19   : > { %v3422_v38 = vand.u32 4294901760, %v232_v30  ;;  %v235_v39 = vsel %vm215_vm0, %v180_v26, 0  ;;  %v381_v40 = vand.u32 4294901760, %v3409_v31  ;;  %v3428_v42 = vsub.f32 %v226_v28, %v3414_v34 }
  0x1a   : > { %v391_v41 = vand.u32 4294901760, %v3412_v32  ;;  %2982 = vmatprep.subr.bf16.mxu1 %v2981_v33  ;;  %v3430_v43 = vand.u32 4294901760, %v235_v39  ;;  %v401_v44 = vand.u32 4294901760, %v3418_v36  ;;  %v3434_v45 = vsub.f32 %v229_v29, %v3420_v37 }
  0x1b   : > { %v3437_v46 = vsub.f32 %v232_v30, %v3422_v38  ;;  %v238_v47 = vsel %vm215_vm0, %v181_v35, 0  ;;  %2825 = vmatprep.mubr.f32.mxu0 %v381_v40  ;;  %v382_v48 = vsub.f32 %v3409_v31, %v381_v40  ;;  %v411_v50 = vand.u32 4294901760, %v3428_v42 }
  0x1c   : > { %v392_v49 = vsub.f32 %v3412_v32, %v391_v41  ;;  %v3444_v51 = vsub.f32 %v235_v39, %v3430_v43  ;;  %2826 = vmatmul.mubr.f32.vlgmr.msra.gmra.mrb[0].mxu0 %v391_v41  ;;  %v402_v52 = vsub.f32 %v3418_v36, %v401_v44  ;;  %v421_v53 = vand.u32 4294901760, %v3434_v45 }
  0x1d   : > { %v431_v54 = vand.u32 4294901760, %v3437_v46  ;;  %v3449_v55 = vand.u32 4294901760, %v238_v47  ;;  %v383_v58 = vand.u32 4294901760, %v382_v48  ;;  %2828 = vmatprep.mubr.f32.mxu0 %v401_v44  ;;  %2996 = vmatpush3.bf16.msra.mxu0 %v2993_v14  ;;  %v412_v60 = vsub.f32 %v3428_v42, %v411_v50  ;;  %v188_v14 = vld [vmem:[%s3384_s22 + $0x70] sm:$0xff] }
  0x1e   : > { %v393_v59 = vand.u32 4294901760, %v392_v49  ;;  %v441_v61 = vand.u32 4294901760, %v3444_v51  ;;  %v403_v62 = vand.u32 4294901760, %v402_v52  ;;  %v422_v63 = vsub.f32 %v3434_v45, %v421_v53  ;;  %2998 = vmatprep.subr.bf16.mxu0 %v3371_v4 }
  0x1f   : > { %v432_v0 = vsub.f32 %v3437_v46, %v431_v54  ;;  %v3458_v1 = vsub.f32 %v238_v47, %v3449_v55  ;;  %2669 = vmatprep.mubr.f32.mxu1 %v383_v58  ;;  %v241_v6 = vsel %vm215_vm0, %v182_v56, 0  ;;  %v244_v7 = vsel %vm215_vm0, %v183_v57, 0 }
  0x20   : > { %v442_v5 = vsub.f32 %v3444_v51, %v441_v61  ;;  %2670 = vmatmul.mubr.f32.vlgmr.msra.gmra.mrb[0].mxu1 %v393_v59  ;;  %2829 = vmatmul.mubr.f32.gmra.mrb[2].mxu0 %v411_v50  ;;  %v413_v9 = vand.u32 4294901760, %v412_v60  ;;  %v423_v10 = vand.u32 4294901760, %v422_v63  ;;  %v3468_v12 = vand.u32 4294901760, %v241_v6  ;;  %v190_v59 = vld [vmem:[%s3384_s22 + $0x80] sm:$0xff] }
  0x21   : > { %4070 = vst [vmem:[#allocation2_spill] sm:$0xff] %v3458_v1  ;;  %v451_v11 = vand.u32 4294901760, %v3458_v1  ;;  %2984 = vmatpush3.bf16.msra.mxu1 %v2981_v33  ;;  %2672 = vmatprep.mubr.f32.mxu1 %v403_v62  ;;  %v433_v15 = vand.u32 4294901760, %v432_v0  ;;  %v3472_v16 = vand.u32 4294901760, %v244_v7  ;;  %v247_v17 = vsel %vm215_vm0, %v184_v2, 0  ;;  %v189_v33 = vld [vmem:[%s3384_s22 + $0x78] sm:$0xff] }
  0x22   : > { %v250_v18 = vsel %vm215_vm0, %v185_v3, 0  ;;  %2831 = vmatprep.mubr.f32.mxu0 %v421_v53  ;;  %v443_v19 = vand.u32 4294901760, %v442_v5  ;;  %v3477_v20 = vsub.f32 %v241_v6, %v3468_v12  ;;  %v3479_v24 = vand.u32 4294901760, %v247_v17  ;;  %2986 = vmatprep.subr.bf16.mxu1 %v3396_v21  ;;  %v191_v3 = vld [vmem:[%s3384_s22 + $0x88] sm:$0xff]  ;;  %v192_v5 = vld [vmem:[%s3384_s22 + $0x90] sm:$0xff] }
  0x23   : > { %v3481_v25 = vand.u32 4294901760, %v250_v18  ;;  %v3485_v26 = vsub.f32 %v244_v7, %v3472_v16  ;;  %v253_v28 = vsel %vm215_vm0, %v186_v8, 0  ;;  %v256_v29 = vsel %vm215_vm0, %v187_v13, 0  ;;  %v193_v8 = vld [vmem:[%s3384_s22 + $0x98] sm:$0xff] }
  0x24   : > { %4071 = vst [vmem:[#allocation3_spill] sm:$0xff] %v3477_v20  ;;  %v259_v30 = vsel %vm215_vm0, %v188_v14, 0  ;;  %2673 = vmatmul.mubr.f32.gmra.mrb[2].mxu1 %v413_v9  ;;  %2832 = vmatmul.mubr.f32.gmra.mrb[4].mxu0 %v431_v54  ;;  %v461_v35 = vand.u32 4294901760, %v3477_v20  ;;  %v452_v39 = vsub.f32 %v3458_v1, %v451_v11  ;;  %v3494_v40 = vsub.f32 %v247_v17, %v3479_v24 }
  0x25   : > { %4072 = vst [vmem:[#allocation4_spill] sm:$0xff] %v3485_v26  ;;  %v3497_v41 = vsub.f32 %v250_v18, %v3481_v25  ;;  %2675 = vmatprep.mubr.f32.mxu1 %v423_v10  ;;  %2834 = vmatprep.mubr.f32.mxu0 %v441_v61  ;;  %v471_v44 = vand.u32 4294901760, %v3485_v26  ;;  %v3500_v47 = vand.u32 4294901760, %v253_v28  ;;  %v3502_v48 = vand.u32 4294901760, %v256_v29  ;;  %v194_v18 = vld [vmem:[%s3384_s22 + $0xa0] sm:$0xff] }
  0x26   : > { %4073 = vst [vmem:[#allocation5_spill] sm:$0xff] %v3494_v40  ;;  %v3504_v49 = vand.u32 4294901760, %v259_v30  ;;  %v462_v50 = vsub.f32 %v3477_v20, %v461_v35  ;;  %v481_v52 = vand.u32 4294901760, %v3494_v40  ;;  %v262_v54 = vsel %vm215_vm0, %v189_v33, 0  ;;  %v195_v33 = vld [vmem:[%s3384_s22 + $0xa8] sm:$0xff]  ;;  %v204_v20 = vld [vmem:[%s3384_s22 + $0xf0] sm:$0xff] }
  0x27   : > { %4074 = vst [vmem:[#allocation6_spill] sm:$0xff] %v3497_v41  ;;  %v491_v53 = vand.u32 4294901760, %v3497_v41  ;;  %v3511_v56 = vsub.f32 %v253_v28, %v3500_v47  ;;  %v3514_v57 = vsub.f32 %v256_v29, %v3502_v48  ;;  %v453_v60 = vand.u32 4294901760, %v452_v39 }
  0x28   : > { %v3517_v58 = vsub.f32 %v259_v30, %v3504_v49  ;;  %2676 = vmatmul.mubr.f32.gmra.mrb[4].mxu1 %v433_v15  ;;  %2835 = vmatmul.mubr.f32.gmra.mrb[6].mxu0 %v451_v11  ;;  %v472_v61 = vsub.f32 %v3485_v26, %v471_v44  ;;  %v3521_v62 = vand.u32 4294901760, %v262_v54  ;;  %v463_v63 = vand.u32 4294901760, %v462_v50 }
  0x29   : > { %4075 = vst [vmem:[#allocation7_spill] sm:$0xff] %v3511_v56  ;;  %4076 = vst [vmem:[#allocation8_spill] sm:$0xff] %v3514_v57  ;;  %2678 = vmatprep.mubr.f32.mxu1 %v443_v19  ;;  %2837 = vmatprep.mubr.f32.mxu0 %v461_v35  ;;  %v482_v0 = vsub.f32 %v3494_v40, %v481_v52  ;;  %v501_v2 = vand.u32 4294901760, %v3511_v56  ;;  %v492_v6 = vsub.f32 %v3497_v41, %v491_v53  ;;  %v196_v35 = vld [vmem:[%s3384_s22 + $0xb0] sm:$0xff] }
  0x2a   : > { %4077 = vst [vmem:[#allocation9_spill] sm:$0xff] %v3517_v58  ;;  %v265_v7 = vsel %vm215_vm0, %v190_v59, 0  ;;  %v511_v9 = vand.u32 4294901760, %v3514_v57  ;;  %v521_v10 = vand.u32 4294901760, %v3517_v58  ;;  %v3533_v11 = vsub.f32 %v262_v54, %v3521_v62 }
  0x2b   : > { %v3535_v13 = vand.u32 4294901760, %v265_v7  ;;  %v473_v14 = vand.u32 4294901760, %v472_v61  ;;  %v268_v15 = vsel %vm215_vm0, %v191_v3, 0  ;;  %v271_v17 = vsel %vm215_vm0, %v192_v5, 0 }
  0x2c   : > { %4078 = vst [vmem:[#allocation10_spill] sm:$0xff] %v3533_v11  ;;  %2679 = vmatmul.mubr.f32.gmra.mrb[6].mxu1 %v453_v60  ;;  %2838 = vmatmul.mubr.f32.gmra.mrb[8].mxu0 %v471_v44  ;;  %v483_v19 = vand.u32 4294901760, %v482_v0  ;;  %v502_v28 = vsub.f32 %v3511_v56, %v501_v2  ;;  %v274_v30 = vsel %vm215_vm0, %v193_v8, 0  ;;  %v493_v39 = vand.u32 4294901760, %v492_v6 }
  0x2d   : > { %2681 = vmatprep.mubr.f32.mxu1 %v463_v63  ;;  %2840 = vmatprep.mubr.f32.mxu0 %v481_v52  ;;  %v3542_v29 = vsub.f32 %v265_v7, %v3535_v13  ;;  %v3547_v44 = vand.u32 4294901760, %v268_v15  ;;  %v3549_v50 = vand.u32 4294901760, %v271_v17  ;;  %v512_v54 = vsub.f32 %v3514_v57, %v511_v9 }
  0x2e   : > { %v531_v52 = vand.u32 4294901760, %v3533_v11  ;;  %v522_v59 = vsub.f32 %v3517_v58, %v521_v10  ;;  %v277_v60 = vsel %vm215_vm0, %v194_v18, 0  ;;  %v3558_v63 = vand.u32 4294901760, %v274_v30 }
  0x2f   : > { %4079 = vst [vmem:[#allocation11_spill] sm:$0xff] %v3542_v29  ;;  %v3556_v61 = vsub.f32 %v268_v15, %v3547_v44  ;;  %v280_v0 = vsel %vm215_vm0, %v195_v33, 0  ;;  %v283_v3 = vsel %vm215_vm0, %v196_v35, 0  ;;  %v503_v5 = vand.u32 4294901760, %v502_v28 }
  0x30   : > { %2682 = vmatmul.mubr.f32.gmra.mrb[8].mxu1 %v473_v14  ;;  %2841 = vmatmul.mubr.f32.gmra.mrb[10].mxu0 %v491_v53  ;;  %v541_v6 = vand.u32 4294901760, %v3542_v29  ;;  %v3564_v7 = vsub.f32 %v271_v17, %v3549_v50  ;;  %v3566_v8 = vand.u32 4294901760, %v277_v60  ;;  %v197_v53 = vld [vmem:[%s3384_s22 + $0xb8] sm:$0xff]  ;;  %v198_v14 = vld [vmem:[%s3384_s22 + $0xc0] sm:$0xff]  ;;  %v513_v15 = vand.u32 4294901760, %v512_v54 }
  0x31   : > { %4080 = vst [vmem:[#allocation12_spill] sm:$0xff] %v3556_v61  ;;  %2684 = vmatprep.mubr.f32.mxu1 %v483_v19  ;;  %2843 = vmatprep.mubr.f32.mxu0 %v501_v2  ;;  %v523_v18 = vand.u32 4294901760, %v522_v59  ;;  %v3570_v58 = vand.u32 4294901760, %v280_v0  ;;  %v3572_v33 = vand.u32 4294901760, %v283_v3  ;;  %v532_v2 = vsub.f32 %v3533_v11, %v531_v52 }
  0x32   : > { %4081 = vst [vmem:[#allocation13_spill] sm:$0xff] %v3564_v7  ;;  %v551_v19 = vand.u32 4294901760, %v3556_v61  ;;  %v3577_v17 = vsub.f32 %v274_v30, %v3558_v63  ;;  %v286_v28 = vsel %vm215_vm0, %v197_v53, 0  ;;  %v542_v35 = vsub.f32 %v3542_v29, %v541_v6 }
  0x33   : > { %v561_v54 = vand.u32 4294901760, %v3564_v7  ;;  %v3583_v59 = vsub.f32 %v277_v60, %v3566_v8  ;;  %v3588_v11 = vsub.f32 %v280_v0, %v3570_v58  ;;  %v3591_v30 = vsub.f32 %v283_v3, %v3572_v33 }
  0x34   : > { %2685 = vmatmul.mubr.f32.gmra.mrb[10].mxu1 %v493_v39  ;;  %2844 = vmatmul.mubr.f32.gmra.mrb[12].mxu0 %v511_v9  ;;  %4082 = vst [vmem:[#allocation14_spill] sm:$0xff] %v3577_v17  ;;  %v289_v9 = vsel %vm215_vm0, %v198_v14, 0  ;;  %v199_v39 = vld [vmem:[%s3384_s22 + $0xc8] sm:$0xff]  ;;  %v3593_v53 = vand.u32 4294901760, %v286_v28  ;;  %v552_v60 = vsub.f32 %v3556_v61, %v551_v19  ;;  %v571_v29 = vand.u32 4294901760, %v3577_v17 }
  0x35   : > { %2687 = vmatprep.mubr.f32.mxu1 %v503_v5  ;;  %2846 = vmatprep.mubr.f32.mxu0 %v521_v10  ;;  %4083 = vst [vmem:[#allocation15_spill] sm:$0xff] %v3583_v59  ;;  %4084 = vst [vmem:[#allocation16_spill] sm:$0xff] %v3588_v11  ;;  %v200_v10 = vld [vmem:[%s3384_s22 + $0xd0] sm:$0xff]  ;;  %v533_v5 = vand.u32 4294901760, %v532_v2  ;;  %v3598_v14 = vand.u32 4294901760, %v289_v9  ;;  %v543_v0 = vand.u32 4294901760, %v542_v35  ;;  %v562_v3 = vsub.f32 %v3564_v7, %v561_v54 }
  0x36   : > { %4085 = vst [vmem:[#allocation17_spill] sm:$0xff] %v3591_v30  ;;  %v581_v57 = vand.u32 4294901760, %v3583_v59  ;;  %v292_v56 = vsel %vm215_vm0, %v199_v39, 0  ;;  %v591_v2 = vand.u32 4294901760, %v3588_v11  ;;  %v601_v61 = vand.u32 4294901760, %v3591_v30 }
  0x37   : > { %v3608_v41 = vsub.f32 %v286_v28, %v3593_v53  ;;  %v572_v35 = vsub.f32 %v3577_v17, %v571_v29  ;;  %v3613_v39 = vsub.f32 %v289_v9, %v3598_v14  ;;  %v563_v7 = vand.u32 4294901760, %v562_v3 }
  0x38   : > { %2688 = vmatmul.mubr.f32.gmra.mrb[12].mxu1 %v513_v15  ;;  %2847 = vmatmul.mubr.f32.gmra.mrb[14].mxu0 %v531_v52  ;;  %v295_v15 = vsel %vm215_vm0, %v200_v10, 0  ;;  %v201_v52 = vld [vmem:[%s3384_s22 + $0xd8] sm:$0xff]  ;;  %v3615_v10 = vand.u32 4294901760, %v292_v56  ;;  %v582_v40 = vsub.f32 %v3583_v59, %v581_v57  ;;  %v602_v9 = vsub.f32 %v3591_v30, %v601_v61 }
  0x39   : > { %2690 = vmatprep.mubr.f32.mxu1 %v523_v18  ;;  %2849 = vmatprep.mubr.f32.mxu0 %v541_v6  ;;  %4086 = vst [vmem:[#allocation18_spill] sm:$0xff] %v3608_v41  ;;  %v202_v18 = vld [vmem:[%s3384_s22 + $0xe0] sm:$0xff]  ;;  %v553_v6 = vand.u32 4294901760, %v552_v60  ;;  %4087 = vst [vmem:[#allocation19_spill] sm:$0xff] %v3613_v39  ;;  %v3618_v26 = vand.u32 4294901760, %v295_v15  ;;  %v298_v28 = vsel %vm215_vm0, %v201_v52, 0  ;;  %v592_v60 = vsub.f32 %v3588_v11, %v591_v2 }
  0x3a   : > { %v611_v17 = vand.u32 4294901760, %v3608_v41  ;;  %v3629_v3 = vsub.f32 %v292_v56, %v3615_v10  ;;  %v3631_v52 = vand.u32 4294901760, %v298_v28  ;;  %v603_v1 = vand.u32 4294901760, %v602_v9 }
  0x3b   : > { %v3634_v11 = vsub.f32 %v295_v15, %v3618_v26 }
  0x3c   : > { %2691 = vmatmul.mubr.f32.gmra.mrb[14].mxu1 %v533_v5  ;;  %2850 = vmatmul.mubr.f32.gmra.mrb[16].mxu0 %v551_v19  ;;  %v301_v19 = vsel %vm215_vm0, %v202_v18, 0  ;;  %v203_v5 = vld [vmem:[%s3384_s22 + $0xe8] sm:$0xff]  ;;  %v583_v18 = vand.u32 4294901760, %v582_v40  ;;  %v612_v56 = vsub.f32 %v3608_v41, %v611_v17 }
  0x3d   : > { %2693 = vmatprep.mubr.f32.mxu1 %v543_v0  ;;  %2852 = vmatprep.mubr.f32.mxu0 %v561_v54  ;;  %v573_v54 = vand.u32 4294901760, %v572_v35  ;;  %v621_v0 = vand.u32 4294901760, %v3613_v39  ;;  %v3636_v59 = vand.u32 4294901760, %v301_v19  ;;  %v304_v30 = vsel %vm215_vm0, %v203_v5, 0 }
  0x3e   : > { %v593_v35 = vand.u32 4294901760, %v592_v60  ;;  %v3647_v15 = vand.u32 4294901760, %v304_v30  ;;  %v613_v9 = vand.u32 4294901760, %v612_v56 }
  0x3f   : > { %v622_v40 = vsub.f32 %v3613_v39, %v621_v0  ;;  %v3651_v5 = vsub.f32 %v301_v19, %v3636_v59 }
  0x40   : > { %2694 = vmatmul.mubr.f32.gmra.mrb[16].mxu1 %v553_v6  ;;  %2853 = vmatmul.mubr.f32.gmra.mrb[18].mxu0 %v571_v29  ;;  %v307_v29 = vsel %vm215_vm0, %v204_v20, 0  ;;  %v205_v6 = vld [vmem:[%s3384_s22 + $0xf8] sm:$0xff]  ;;  %v641_v20 = vand.u32 4294901760, %v3634_v11  ;;  %v3659_v39 = vsub.f32 %v304_v30, %v3647_v15 }
  0x41   : > { %2696 = vmatprep.mubr.f32.mxu1 %v563_v7  ;;  %2855 = vmatprep.mubr.f32.mxu0 %v581_v57  ;;  %v631_v7 = vand.u32 4294901760, %v3629_v3  ;;  %v3645_v57 = vsub.f32 %v298_v28, %v3631_v52  ;;  %v3653_v60 = vand.u32 4294901760, %v307_v29  ;;  %v623_v19 = vand.u32 4294901760, %v622_v40 }
  0x42   : > { %v661_v41 = vand.u32 4294901760, %v3651_v5  ;;  %v671_v30 = vand.u32 4294901760, %v3659_v39 }
  0x43   : > { %v651_v28 = vand.u32 4294901760, %v3645_v57 }
  0x44   : > { %2697 = vmatmul.mubr.f32.gmra.mrb[18].mxu1 %v573_v54  ;;  %2856 = vmatmul.mubr.f32.gmra.mrb[20].mxu0 %v591_v2  ;;  %v310_v2 = vsel %vm215_vm0, %v205_v6, 0  ;;  %v632_v54 = vsub.f32 %v3629_v3, %v631_v7  ;;  %v3666_v6 = vsub.f32 %v307_v29, %v3653_v60 }
  0x45   : > { %2699 = vmatprep.mubr.f32.mxu1 %v583_v18  ;;  %2858 = vmatprep.mubr.f32.mxu0 %v601_v61  ;;  %v3661_v61 = vand.u32 4294901760, %v310_v2  ;;  %v642_v18 = vsub.f32 %v3634_v11, %v641_v20 }
  0x46   : > { %v681_v40 = vand.u32 4294901760, %v3666_v6 }
  0x47   : > { %v3671_v56 = vsub.f32 %v310_v2, %v3661_v61 }
  0x48   : > { %2700 = vmatmul.mubr.f32.gmra.mrb[20].mxu1 %v593_v35  ;;  %2859 = vmatmul.mubr.f32.gmra.mrb[22].mxu0 %v611_v17  ;;  %v633_v17 = vand.u32 4294901760, %v632_v54  ;;  %v652_v35 = vsub.f32 %v3645_v57, %v651_v28  ;;  %v682_v2 = vsub.f32 %v3666_v6, %v681_v40 }
  0x49   : > { %2702 = vmatprep.mubr.f32.mxu1 %v603_v1  ;;  %2861 = vmatprep.mubr.f32.mxu0 %v621_v0  ;;  %v643_v1 = vand.u32 4294901760, %v642_v18  ;;  %v662_v0 = vsub.f32 %v3651_v5, %v661_v41 }
  0x4a   : > { %v653_v29 = vand.u32 4294901760, %v652_v35  ;;  %v683_v18 = vand.u32 4294901760, %v682_v2 }
  0x4b   : > { %v663_v54 = vand.u32 4294901760, %v662_v0 }
  0x4c   : > { %2703 = vmatmul.mubr.f32.gmra.mrb[22].mxu1 %v613_v9  ;;  %2862 = vmatmul.mubr.f32.gmra.mrb[24].mxu0 %v631_v7  ;;  %v672_v7 = vsub.f32 %v3659_v39, %v671_v30  ;;  %v691_v9 = vand.u32 4294901760, %v3671_v56 }
  0x4d   : > { %2705 = vmatprep.mubr.f32.mxu1 %v623_v19  ;;  %2864 = vmatprep.mubr.f32.mxu0 %v641_v20 }
  0x4e   : > { %v673_v20 = vand.u32 4294901760, %v672_v7  ;;  %v692_v19 = vsub.f32 %v3671_v56, %v691_v9 }
  0x50   : > { %2706 = vmatmul.mubr.f32.gmra.mrb[24].mxu1 %v633_v17  ;;  %2865 = vmatmul.mubr.f32.gmra.mrb[26].mxu0 %v651_v28  ;;  %v693_v28 = vand.u32 4294901760, %v692_v19 }
  0x51   : > { %2708 = vmatprep.mubr.f32.mxu1 %v643_v1  ;;  %2867 = vmatprep.mubr.f32.mxu0 %v661_v41 }
  0x54   : > { %2709 = vmatmul.mubr.f32.gmra.mrb[26].mxu1 %v653_v29  ;;  %2868 = vmatmul.mubr.f32.gmra.mrb[28].mxu0 %v671_v30 }
  0x55   : > { %2711 = vmatprep.mubr.f32.mxu1 %v663_v54  ;;  %2870 = vmatprep.mubr.f32.mxu0 %v681_v40 }
  0x58   : > { %2712 = vmatmul.mubr.f32.gmra.mrb[28].mxu1 %v673_v20  ;;  %2871 = vmatmul.mubr.f32.gmra.mrb[30].mxu0 %v691_v9 }
  0x59   : > { %2714 = vmatprep.mubr.f32.mxu1 %v683_v18  ;;  %2877 = vmatprep.mubr.f32.mxu0 %v3398_v22 }
  0x5c   : > { %2715 = vmatmul.mubr.f32.gmra.mrb[30].mxu1 %v693_v28  ;;  %2878 = vmatmul.mubr.f32.vlgmr.msra.gmra.mrb[0].mxu0 %v3400_v23 }
  0x5d   : > { %2721 = vmatprep.mubr.f32.mxu1 %v3398_v22  ;;  %2880 = vmatprep.mubr.f32.mxu0 %v3403_v27 }
  0x5e   : > { %3000 = vmatpush3.bf16.msra.mxu0 %v3371_v4  ;;  %v4088_v4 = vld [vmem:[#allocation2_spill] sm:$0xff] }
  0x60   : > { %2722 = vmatmul.mubr.f32.vlgmr.msra.gmra.mrb[0].mxu1 %v3400_v23  ;;  %2881 = vmatmul.mubr.f32.gmra.mrb[2].mxu0 %v3414_v34 }
  0x61   : > { %2988 = vmatpush3.bf16.msra.mxu1 %v3396_v21  ;;  %2724 = vmatprep.mubr.f32.mxu1 %v3403_v27  ;;  %v4089_v21 = vld [vmem:[#allocation3_spill] sm:$0xff] }
  0x62   : > { %2883 = vmatprep.mubr.f32.mxu0 %v3420_v37 }
  0x64   : > { %2725 = vmatmul.mubr.f32.gmra.mrb[2].mxu1 %v3414_v34  ;;  %2884 = vmatmul.mubr.f32.gmra.mrb[4].mxu0 %v3422_v38 }
  0x65   : > { %2727 = vmatprep.mubr.f32.mxu1 %v3420_v37  ;;  %2886 = vmatprep.mubr.f32.mxu0 %v3430_v43 }
  0x68   : > { %2728 = vmatmul.mubr.f32.gmra.mrb[4].mxu1 %v3422_v38  ;;  %2887 = vmatmul.mubr.f32.gmra.mrb[6].mxu0 %v3449_v55 }
  0x69   : > { %2730 = vmatprep.mubr.f32.mxu1 %v3430_v43  ;;  %2889 = vmatprep.mubr.f32.mxu0 %v3468_v12 }
  0x6c   : > { %2731 = vmatmul.mubr.f32.gmra.mrb[6].mxu1 %v3449_v55  ;;  %2890 = vmatmul.mubr.f32.gmra.mrb[8].mxu0 %v3472_v16 }
  0x6d   : > { %2733 = vmatprep.mubr.f32.mxu1 %v3468_v12  ;;  %2892 = vmatprep.mubr.f32.mxu0 %v3479_v24 }
  0x70   : > { %2734 = vmatmul.mubr.f32.gmra.mrb[8].mxu1 %v3472_v16  ;;  %2893 = vmatmul.mubr.f32.gmra.mrb[10].mxu0 %v3481_v25 }
  0x71   : > { %2736 = vmatprep.mubr.f32.mxu1 %v3479_v24  ;;  %2895 = vmatprep.mubr.f32.mxu0 %v3500_v47 }
  0x74   : > { %2737 = vmatmul.mubr.f32.gmra.mrb[10].mxu1 %v3481_v25  ;;  %2896 = vmatmul.mubr.f32.gmra.mrb[12].mxu0 %v3502_v48 }
  0x75   : > { %2739 = vmatprep.mubr.f32.mxu1 %v3500_v47  ;;  %2898 = vmatprep.mubr.f32.mxu0 %v3504_v49 }
  0x78   : > { %2740 = vmatmul.mubr.f32.gmra.mrb[12].mxu1 %v3502_v48  ;;  %2899 = vmatmul.mubr.f32.gmra.mrb[14].mxu0 %v3521_v62 }
  0x79   : > { %2742 = vmatprep.mubr.f32.mxu1 %v3504_v49  ;;  %2901 = vmatprep.mubr.f32.mxu0 %v3535_v13 }
  0x7c   : > { %2743 = vmatmul.mubr.f32.gmra.mrb[14].mxu1 %v3521_v62  ;;  %2902 = vmatmul.mubr.f32.gmra.mrb[16].mxu0 %v3547_v44 }
  0x7d   : > { %2745 = vmatprep.mubr.f32.mxu1 %v3535_v13  ;;  %2904 = vmatprep.mubr.f32.mxu0 %v3549_v50 }
  0x80   : > { %2746 = vmatmul.mubr.f32.gmra.mrb[16].mxu1 %v3547_v44  ;;  %2905 = vmatmul.mubr.f32.gmra.mrb[18].mxu0 %v3558_v63 }
  0x81   : > { %2748 = vmatprep.mubr.f32.mxu1 %v3549_v50  ;;  %2907 = vmatprep.mubr.f32.mxu0 %v3566_v8 }
  0x84   : > { %2749 = vmatmul.mubr.f32.gmra.mrb[18].mxu1 %v3558_v63  ;;  %2908 = vmatmul.mubr.f32.gmra.mrb[20].mxu0 %v3570_v58 }
  0x85   : > { %2751 = vmatprep.mubr.f32.mxu1 %v3566_v8  ;;  %2910 = vmatprep.mubr.f32.mxu0 %v3572_v33 }
  0x88   : > { %2752 = vmatmul.mubr.f32.gmra.mrb[20].mxu1 %v3570_v58  ;;  %2911 = vmatmul.mubr.f32.gmra.mrb[22].mxu0 %v3593_v53 }
  0x89   : > { %2754 = vmatprep.mubr.f32.mxu1 %v3572_v33  ;;  %2913 = vmatprep.mubr.f32.mxu0 %v3598_v14 }
  0x8c   : > { %2755 = vmatmul.mubr.f32.gmra.mrb[22].mxu1 %v3593_v53  ;;  %2914 = vmatmul.mubr.f32.gmra.mrb[24].mxu0 %v3615_v10 }
  0x8d   : > { %2757 = vmatprep.mubr.f32.mxu1 %v3598_v14  ;;  %2916 = vmatprep.mubr.f32.mxu0 %v3618_v26 }
  0x90   : > { %2758 = vmatmul.mubr.f32.gmra.mrb[24].mxu1 %v3615_v10  ;;  %2917 = vmatmul.mubr.f32.gmra.mrb[26].mxu0 %v3631_v52 }
  0x91   : > { %2760 = vmatprep.mubr.f32.mxu1 %v3618_v26  ;;  %2919 = vmatprep.mubr.f32.mxu0 %v3636_v59 }
  0x94   : > { %2761 = vmatmul.mubr.f32.gmra.mrb[26].mxu1 %v3631_v52  ;;  %2920 = vmatmul.mubr.f32.gmra.mrb[28].mxu0 %v3647_v15 }
  0x95   : > { %2763 = vmatprep.mubr.f32.mxu1 %v3636_v59  ;;  %2922 = vmatprep.mubr.f32.mxu0 %v3653_v60 }
  0x98   : > { %2764 = vmatmul.mubr.f32.gmra.mrb[28].mxu1 %v3647_v15  ;;  %2923 = vmatmul.mubr.f32.gmra.mrb[30].mxu0 %v3661_v61 }
  0x99   : > { %2766 = vmatprep.mubr.f32.mxu1 %v3653_v60  ;;  %2929 = vmatprep.mubr.f32.mxu0 %v3398_v22  ;;  %v4090_v22 = vld [vmem:[#allocation4_spill] sm:$0xff] }
  0x9c   : > { %2767 = vmatmul.mubr.f32.gmra.mrb[30].mxu1 %v3661_v61  ;;  %2930 = vmatmul.mubr.f32.vlgmr.msra.gmra.mrb[0].mxu0 %v3400_v23  ;;  %v4091_v23 = vld [vmem:[#allocation5_spill] sm:$0xff] }
  0x9d   : > { %2773 = vmatprep.mubr.f32.mxu1 %v3409_v31  ;;  %2932 = vmatprep.mubr.f32.mxu0 %v3403_v27  ;;  %v4092_v27 = vld [vmem:[#allocation6_spill] sm:$0xff]  ;;  %v4093_v31 = vld [vmem:[#allocation7_spill] sm:$0xff] }
  0xa0   : > { %2774 = vmatmul.mubr.f32.vlgmr.msra.gmra.mrb[0].mxu1 %v3412_v32  ;;  %2933 = vmatmul.mubr.f32.gmra.mrb[2].mxu0 %v3414_v34  ;;  %v4094_v32 = vld [vmem:[#allocation8_spill] sm:$0xff]  ;;  %v4095_v34 = vld [vmem:[#allocation9_spill] sm:$0xff] }
  0xa1   : > { %2776 = vmatprep.mubr.f32.mxu1 %v3418_v36  ;;  %2935 = vmatprep.mubr.f32.mxu0 %v3420_v37  ;;  %v4096_v36 = vld [vmem:[#allocation10_spill] sm:$0xff]  ;;  %v4097_v37 = vld [vmem:[#allocation11_spill] sm:$0xff] }
  0xa4   : > { %2777 = vmatmul.mubr.f32.gmra.mrb[2].mxu1 %v3428_v42  ;;  %2936 = vmatmul.mubr.f32.gmra.mrb[4].mxu0 %v3422_v38  ;;  %v4098_v38 = vld [vmem:[#allocation12_spill] sm:$0xff]  ;;  %v4099_v42 = vld [vmem:[#allocation13_spill] sm:$0xff] }
  0xa5   : > { %2779 = vmatprep.mubr.f32.mxu1 %v3434_v45  ;;  %2938 = vmatprep.mubr.f32.mxu0 %v3430_v43  ;;  %v4100_v43 = vld [vmem:[#allocation14_spill] sm:$0xff]  ;;  %v4101_v45 = vld [vmem:[#allocation15_spill] sm:$0xff] }
  0xa8   : > { %2780 = vmatmul.mubr.f32.gmra.mrb[4].mxu1 %v3437_v46  ;;  %2939 = vmatmul.mubr.f32.gmra.mrb[6].mxu0 %v3449_v55  ;;  %v4102_v46 = vld [vmem:[#allocation16_spill] sm:$0xff]  ;;  %v4104_v55 = vld [vmem:[#allocation18_spill] sm:$0xff] }
  0xa9   : > { %2782 = vmatprep.mubr.f32.mxu1 %v3444_v51  ;;  %2941 = vmatprep.mubr.f32.mxu0 %v3468_v12  ;;  %v4103_v51 = vld [vmem:[#allocation17_spill] sm:$0xff]  ;;  %v4105_v12 = vld [vmem:[#allocation19_spill] sm:$0xff] }
  0xac   : > { %2783 = vmatmul.mubr.f32.gmra.mrb[6].mxu1 %v4088_v4  ;;  %2942 = vmatmul.mubr.f32.gmra.mrb[8].mxu0 %v3472_v16 }
  0xad   : > { %2785 = vmatprep.mubr.f32.mxu1 %v4089_v21  ;;  %2944 = vmatprep.mubr.f32.mxu0 %v3479_v24 }
  0xb0   : > { %2786 = vmatmul.mubr.f32.gmra.mrb[8].mxu1 %v4090_v22  ;;  %2945 = vmatmul.mubr.f32.gmra.mrb[10].mxu0 %v3481_v25  ;;  %v3812_v25 = vld [vmem:[%s4050_s2] ss:$0 sm:$0xff] }
  0xb1   : > { %2788 = vmatprep.mubr.f32.mxu1 %v4091_v23  ;;  %2947 = vmatprep.mubr.f32.mxu0 %v3500_v47 }
  0xb4   : > { %2789 = vmatmul.mubr.f32.gmra.mrb[10].mxu1 %v4092_v27  ;;  %2948 = vmatmul.mubr.f32.gmra.mrb[12].mxu0 %v3502_v48 }
  0xb5   : > { %2791 = vmatprep.mubr.f32.mxu1 %v4093_v31  ;;  %2950 = vmatprep.mubr.f32.mxu0 %v3504_v49 }
  0xb8   : > { %2792 = vmatmul.mubr.f32.gmra.mrb[12].mxu1 %v4094_v32  ;;  %2951 = vmatmul.mubr.f32.gmra.mrb[14].mxu0 %v3521_v62 }
  0xb9   : > { %2794 = vmatprep.mubr.f32.mxu1 %v4095_v34  ;;  %2953 = vmatprep.mubr.f32.mxu0 %v3535_v13 }
  0xbc   : > { %2795 = vmatmul.mubr.f32.gmra.mrb[14].mxu1 %v4096_v36  ;;  %2954 = vmatmul.mubr.f32.gmra.mrb[16].mxu0 %v3547_v44 }
  0xbd   : > { %2797 = vmatprep.mubr.f32.mxu1 %v4097_v37  ;;  %2956 = vmatprep.mubr.f32.mxu0 %v3549_v50 }
  0xc0   : > { %2798 = vmatmul.mubr.f32.gmra.mrb[16].mxu1 %v4098_v38  ;;  %2957 = vmatmul.mubr.f32.gmra.mrb[18].mxu0 %v3558_v63 }
  0xc1   : > { %2800 = vmatprep.mubr.f32.mxu1 %v4099_v42  ;;  %2959 = vmatprep.mubr.f32.mxu0 %v3566_v8 }
  0xc4   : > { %2801 = vmatmul.mubr.f32.gmra.mrb[18].mxu1 %v4100_v43  ;;  %2960 = vmatmul.mubr.f32.gmra.mrb[20].mxu0 %v3570_v58 }
  0xc5   : > { %2803 = vmatprep.mubr.f32.mxu1 %v4101_v45  ;;  %2962 = vmatprep.mubr.f32.mxu0 %v3572_v33 }
  0xc8   : > { %2804 = vmatmul.mubr.f32.gmra.mrb[20].mxu1 %v4102_v46  ;;  %2963 = vmatmul.mubr.f32.gmra.mrb[22].mxu0 %v3593_v53 }
  0xc9   : > { %2806 = vmatprep.mubr.f32.mxu1 %v4103_v51  ;;  %2965 = vmatprep.mubr.f32.mxu0 %v3598_v14 }
  0xcc   : > { %2807 = vmatmul.mubr.f32.gmra.mrb[22].mxu1 %v4104_v55  ;;  %2966 = vmatmul.mubr.f32.gmra.mrb[24].mxu0 %v3615_v10 }
  0xcd   : > { %2809 = vmatprep.mubr.f32.mxu1 %v4105_v12  ;;  %2968 = vmatprep.mubr.f32.mxu0 %v3618_v26 }
  0xd0   : > { %2810 = vmatmul.mubr.f32.gmra.mrb[24].mxu1 %v3629_v3  ;;  %2969 = vmatmul.mubr.f32.gmra.mrb[26].mxu0 %v3631_v52 }
  0xd1   : > { %2812 = vmatprep.mubr.f32.mxu1 %v3634_v11  ;;  %2971 = vmatprep.mubr.f32.mxu0 %v3636_v59 }
  0xd4   : > { %2813 = vmatmul.mubr.f32.gmra.mrb[26].mxu1 %v3645_v57  ;;  %2972 = vmatmul.mubr.f32.gmra.mrb[28].mxu0 %v3647_v15 }
  0xd5   : > { %2815 = vmatprep.mubr.f32.mxu1 %v3651_v5  ;;  %2974 = vmatprep.mubr.f32.mxu0 %v3653_v60 }
  0xd8   : > { %2816 = vmatmul.mubr.f32.gmra.mrb[28].mxu1 %v3659_v39  ;;  %2975 = vmatmul.mubr.f32.gmra.mrb[30].mxu0 %v3661_v61 }
  0xd9   : > { %2818 = vmatprep.mubr.f32.mxu1 %v3666_v6 }
  0xdc   : > { %2819 = vmatmul.mubr.f32.gmra.mrb[30].mxu1 %v3671_v56 }
 0x16f   : > { %v2931_v16 = vpop.f32.mrb[0].mxu0 }
 0x170   : > { %v1914_v24 = vpop.f32.mrb[1].mxu0 }
 0x173   : > { %v2775_v26 = vpop.f32.mrb[0].mxu1  ;;  %v2934_v41 = vpop.f32.mrb[2].mxu0 }
 0x174   : > { %v3001_v47 = vadd.f32 %v2775_v26, %v3812_v25  ;;  %v1038_v48 = vpop.f32.mrb[1].mxu1  ;;  %v1926_v49 = vpop.f32.mrb[3].mxu0 }
 0x175   : > { %v3003_v58 = vadd.f32 %v3812_v25, %v1038_v48 }
 0x176   : > { %v3816_v62 = vadd.f32 %v3001_v47, %v2931_v16 }
 0x177   : > { %v3818_v11 = vadd.f32 %v3003_v58, %v1914_v24  ;;  %v2778_v13 = vpop.f32.mrb[2].mxu1  ;;  %v2937_v44 = vpop.f32.mrb[4].mxu0 }
 0x178   : > { %v2428_v50 = vmul.f32 -1.442695, %v3816_v62  ;;  %v3005_v63 = vadd.f32 %v2778_v13, %v3812_v25  ;;  %v1052_v8 = vpop.f32.mrb[3].mxu1  ;;  %v1938_v33 = vpop.f32.mrb[5].mxu0 }
 0x179   : > { %v2427_v59 = vmul.f32 -1.442695, %v3818_v11  ;;  %v3007_v53 = vadd.f32 %v3812_v25, %v1052_v8 }
 0x17a   : > { %3201 = vpow2.f32 %v2428_v50  ;;  %v3824_v14 = vadd.f32 %v3005_v63, %v2934_v41 }
 0x17b   : > { %3203 = vpow2.f32 %v2427_v59  ;;  %v3826_v39 = vadd.f32 %v3007_v53, %v1926_v49  ;;  %v2781_v10 = vpop.f32.mrb[4].mxu1  ;;  %v2940_v3 = vpop.f32.mrb[6].mxu0 }
 0x17c   : > { %v2430_v52 = vmul.f32 -1.442695, %v3824_v14  ;;  %v3009_v57 = vadd.f32 %v2781_v10, %v3812_v25  ;;  %v1066_v15 = vpop.f32.mrb[5].mxu1  ;;  %v1950_v5 = vpop.f32.mrb[7].mxu0 }
 0x17d   : > { %v2429_v60 = vmul.f32 -1.442695, %v3826_v39  ;;  %v3011_v61 = vadd.f32 %v3812_v25, %v1066_v15 }
 0x17e   : > { %3205 = vpow2.f32 %v2430_v52  ;;  %v3832_v6 = vadd.f32 %v3009_v57, %v2937_v44 }
 0x17f   : > { %3207 = vpow2.f32 %v2429_v60  ;;  %v3834_v17 = vadd.f32 %v3011_v61, %v1938_v33  ;;  %v2784_v35 = vpop.f32.mrb[6].mxu1  ;;  %v2943_v30 = vpop.f32.mrb[8].mxu0 }
 0x180   : > { %v2432_v56 = vmul.f32 -1.442695, %v3832_v6  ;;  %v3013_v1 = vadd.f32 %v2784_v35, %v3812_v25  ;;  %v1080_v0 = vpop.f32.mrb[7].mxu1  ;;  %v1962_v40 = vpop.f32.mrb[9].mxu0 }
 0x181   : > { %v2431_v29 = vmul.f32 -1.442695, %v3834_v17  ;;  %v3015_v7 = vadd.f32 %v3812_v25, %v1080_v0 }
 0x182   : > { %3209 = vpow2.f32 %v2432_v56  ;;  %v3840_v9 = vadd.f32 %v3013_v1, %v2940_v3 }
 0x183   : > { %3211 = vpow2.f32 %v2431_v29  ;;  %v3842_v54 = vadd.f32 %v3015_v7, %v1950_v5  ;;  %v2787_v2 = vpop.f32.mrb[8].mxu1  ;;  %v2946_v20 = vpop.f32.mrb[10].mxu0 }
 0x184   : > { %v3202_v19 = vpop.eup %3201  ;;  %v2434_v18 = vmul.f32 -1.442695, %v3840_v9  ;;  %v3017_v28 = vadd.f32 %v2787_v2, %v3812_v25  ;;  %v1094_v4 = vpop.f32.mrb[9].mxu1 }
 0x185   : > { %v1974_v21 = vpop.f32.mrb[11].mxu0  ;;  %v3204_v22 = vpop.eup %3203  ;;  %v2201_v23 = vadd.f32 1.0, %v3202_v19  ;;  %v2433_v27 = vmul.f32 -1.442695, %v3842_v54  ;;  %v3019_v31 = vadd.f32 %v3812_v25, %v1094_v4 }
 0x186   : > { %v2200_v32 = vadd.f32 1.0, %v3204_v22  ;;  %3213 = vpow2.f32 %v2434_v18  ;;  %v3848_v34 = vadd.f32 %v3017_v28, %v2943_v30 }
 0x187   : > { %3215 = vrcp.f32 %v2201_v23  ;;  %v3850_v36 = vadd.f32 %v3019_v31, %v1962_v40  ;;  %v2790_v37 = vpop.f32.mrb[10].mxu1  ;;  %v2949_v38 = vpop.f32.mrb[12].mxu0 }
 0x188   : > { %v3206_v42 = vpop.eup %3205  ;;  %3217 = vrcp.f32 %v2200_v32  ;;  %v2436_v43 = vmul.f32 -1.442695, %v3848_v34  ;;  %v3021_v45 = vadd.f32 %v2790_v37, %v3812_v25  ;;  %v1108_v46 = vpop.f32.mrb[11].mxu1 }
 0x189   : > { %v1986_v51 = vpop.f32.mrb[13].mxu0  ;;  %v3208_v55 = vpop.eup %3207  ;;  %v2203_v12 = vadd.f32 1.0, %v3206_v42  ;;  %3219 = vpow2.f32 %v2433_v27  ;;  %v2435_v16 = vmul.f32 -1.442695, %v3850_v36  ;;  %v3023_v24 = vadd.f32 %v3812_v25, %v1108_v46 }
 0x18a   : > { %v2202_v26 = vadd.f32 1.0, %v3208_v55  ;;  %3221 = vpow2.f32 %v2436_v43  ;;  %v3856_v41 = vadd.f32 %v3021_v45, %v2946_v20 }
 0x18b   : > { %3223 = vrcp.f32 %v2203_v12  ;;  %v3858_v47 = vadd.f32 %v3023_v24, %v1974_v21  ;;  %v2793_v48 = vpop.f32.mrb[12].mxu1  ;;  %v2952_v49 = vpop.f32.mrb[14].mxu0 }
 0x18c   : > { %v3210_v58 = vpop.eup %3209  ;;  %3225 = vrcp.f32 %v2202_v26  ;;  %v2438_v13 = vmul.f32 -1.442695, %v3856_v41  ;;  %v3025_v44 = vadd.f32 %v2793_v48, %v3812_v25  ;;  %v1122_v50 = vpop.f32.mrb[13].mxu1 }
 0x18d   : > { %v1998_v63 = vpop.f32.mrb[15].mxu0  ;;  %v3212_v8 = vpop.eup %3211  ;;  %v2205_v33 = vadd.f32 1.0, %v3210_v58  ;;  %3227 = vpow2.f32 %v2435_v16  ;;  %v2437_v59 = vmul.f32 -1.442695, %v3858_v47  ;;  %v3027_v53 = vadd.f32 %v3812_v25, %v1122_v50 }
 0x18e   : > { %v2204_v10 = vadd.f32 1.0, %v3212_v8  ;;  %3229 = vpow2.f32 %v2438_v13  ;;  %v3864_v3 = vadd.f32 %v3025_v44, %v2949_v38 }
 0x18f   : > { %3231 = vrcp.f32 %v2205_v33  ;;  %v3866_v52 = vadd.f32 %v3027_v53, %v1986_v51  ;;  %v2796_v57 = vpop.f32.mrb[14].mxu1  ;;  %v2955_v15 = vpop.f32.mrb[16].mxu0 }
 0x190   : > { %v3214_v5 = vpop.eup %3213  ;;  %3233 = vrcp.f32 %v2204_v10  ;;  %v2440_v60 = vmul.f32 -1.442695, %v3864_v3  ;;  %v3029_v61 = vadd.f32 %v2796_v57, %v3812_v25  ;;  %v1136_v35 = vpop.f32.mrb[15].mxu1 }
 0x191   : > { %v2010_v30 = vpop.f32.mrb[17].mxu0  ;;  %v3216_v56 = vpop.eup %3215  ;;  %v2207_v1 = vadd.f32 1.0, %v3214_v5  ;;  %3235 = vpow2.f32 %v2437_v59  ;;  %v2439_v0 = vmul.f32 -1.442695, %v3866_v52  ;;  %v3031_v40 = vadd.f32 %v3812_v25, %v1136_v35 }
 0x192   : > { %v3218_v29 = vpop.eup %3217  ;;  %v2297_v7 = vmul.f32 %v3216_v56, %v3816_v62  ;;  %3237 = vpow2.f32 %v2440_v60  ;;  %v3880_v2 = vadd.f32 %v3029_v61, %v2952_v49 }
 0x193   : > { %v3220_v20 = vpop.eup %3219  ;;  %v2296_v19 = vmul.f32 %v3218_v29, %v3818_v11  ;;  %3239 = vrcp.f32 %v2207_v1  ;;  %v3883_v18 = vadd.f32 %v3031_v40, %v1998_v63  ;;  %v2799_v28 = vpop.f32.mrb[16].mxu1 }
 0x194   : > { %v2958_v4 = vpop.f32.mrb[18].mxu0  ;;  %v3222_v21 = vpop.eup %3221  ;;  %2330 = vst.msk [vmem:[%s3875_s27 + $0x8] sm:$0xff] %vm2328_vm1, %v2297_v7  ;;  %v2206_v22 = vadd.f32 1.0, %v3220_v20  ;;  %3241 = vpow2.f32 %v2439_v0  ;;  %v2442_v23 = vmul.f32 -1.442695, %v3880_v2  ;;  %v3033_v62 = vadd.f32 %v2799_v28, %v3812_v25 }
 0x195   : > { %v1150_v27 = vpop.f32.mrb[17].mxu1  ;;  %v2022_v31 = vpop.f32.mrb[19].mxu0  ;;  %2329 = vst.msk [vmem:[%s3875_s27] sm:$0xff] %vm2328_vm1, %v2296_v19  ;;  %v2209_v11 = vadd.f32 1.0, %v3222_v21  ;;  %v2441_v37 = vmul.f32 -1.442695, %v3883_v18 }
 0x196   : > { %v3224_v32 = vpop.eup %3223  ;;  %v3035_v38 = vadd.f32 %v3812_v25, %v1150_v27  ;;  %3243 = vrcp.f32 %v2206_v22  ;;  %v3894_v45 = vadd.f32 %v3033_v62, %v2955_v15 }
 0x197   : > { %v3226_v42 = vpop.eup %3225  ;;  %v2299_v43 = vmul.f32 %v3224_v32, %v3824_v14  ;;  %3245 = vrcp.f32 %v2209_v11  ;;  %v2802_v12 = vpop.f32.mrb[18].mxu1 }
 0x198   : > { %v3228_v46 = vpop.eup %3227  ;;  %v2298_v51 = vmul.f32 %v3226_v42, %v3826_v39  ;;  %v3897_v55 = vadd.f32 %v3035_v38, %v2010_v30  ;;  %v2961_v16 = vpop.f32.mrb[20].mxu0  ;;  %3247 = vpow2.f32 %v2442_v23  ;;  %v2444_v48 = vmul.f32 -1.442695, %v3894_v45 }
 0x199   : > { %v3230_v24 = vpop.eup %3229  ;;  %2332 = vst.msk [vmem:[%s3875_s27 + $0x18] sm:$0xff] %vm2328_vm1, %v2299_v43  ;;  %v2208_v26 = vadd.f32 1.0, %v3228_v46  ;;  %v3037_v14 = vadd.f32 %v2802_v12, %v3812_v25  ;;  %v1164_v49 = vpop.f32.mrb[19].mxu1  ;;  %3249 = vpow2.f32 %v2441_v37 }
 0x19a   : > { %v2034_v58 = vpop.f32.mrb[21].mxu0  ;;  %v3232_v13 = vpop.eup %3231  ;;  %2331 = vst.msk [vmem:[%s3875_s27 + $0x10] sm:$0xff] %vm2328_vm1, %v2298_v51  ;;  %v2211_v39 = vadd.f32 1.0, %v3230_v24  ;;  %v2443_v44 = vmul.f32 -1.442695, %v3897_v55  ;;  %v3039_v50 = vadd.f32 %v3812_v25, %v1164_v49 }
 0x19b   : > { %v3234_v63 = vpop.eup %3233  ;;  %v2301_v8 = vmul.f32 %v3232_v13, %v3832_v6  ;;  %3251 = vrcp.f32 %v2208_v26  ;;  %v3908_v33 = vadd.f32 %v3037_v14, %v2958_v4  ;;  %v2805_v57 = vpop.f32.mrb[20].mxu1 }
 0x19c   : > { %v3236_v59 = vpop.eup %3235  ;;  %v2300_v53 = vmul.f32 %v3234_v63, %v3834_v17  ;;  %3253 = vrcp.f32 %v2211_v39  ;;  %v3911_v10 = vadd.f32 %v3039_v50, %v2022_v31  ;;  %v2964_v15 = vpop.f32.mrb[22].mxu0  ;;  %v3041_v6 = vadd.f32 %v2805_v57, %v3812_v25 }
 0x19d   : > { %v3238_v5 = vpop.eup %3237  ;;  %2334 = vst.msk [vmem:[%s3875_s27 + $0x28] sm:$0xff] %vm2328_vm1, %v2301_v8  ;;  %v2210_v60 = vadd.f32 1.0, %v3236_v59  ;;  %3255 = vpow2.f32 %v2444_v48  ;;  %v2446_v61 = vmul.f32 -1.442695, %v3908_v33  ;;  %v1178_v35 = vpop.f32.mrb[21].mxu1 }
 0x19e   : > { %v2046_v30 = vpop.f32.mrb[23].mxu0  ;;  %v3240_v56 = vpop.eup %3239  ;;  %2333 = vst.msk [vmem:[%s3875_s27 + $0x20] sm:$0xff] %vm2328_vm1, %v2300_v53  ;;  %v2213_v17 = vadd.f32 1.0, %v3238_v5  ;;  %3257 = vpow2.f32 %v2443_v44  ;;  %v3043_v1 = vadd.f32 %v3812_v25, %v1178_v35  ;;  %v2445_v29 = vmul.f32 -1.442695, %v3911_v10 }
 0x19f   : > { %v3242_v0 = vpop.eup %3241  ;;  %v2303_v40 = vmul.f32 %v3240_v56, %v3840_v9  ;;  %3259 = vrcp.f32 %v2210_v60  ;;  %v3922_v7 = vadd.f32 %v3041_v6, %v2961_v16  ;;  %v2808_v28 = vpop.f32.mrb[22].mxu1 }
 0x1a0   : > { %3261 = vrcp.f32 %v2213_v17  ;;  %v2212_v20 = vadd.f32 1.0, %v3242_v0  ;;  %v3924_v19 = vadd.f32 %v3043_v1, %v2034_v58  ;;  %v2967_v4 = vpop.f32.mrb[24].mxu0  ;;  %v3244_v21 = vpop.eup %3243  ;;  %v3045_v9 = vadd.f32 %v2808_v28, %v3812_v25 }
 0x1a1   : > { %2336 = vst.msk [vmem:[%s3875_s27 + $0x38] sm:$0xff] %vm2328_vm1, %v2303_v40  ;;  %3263 = vpow2.f32 %v2446_v61  ;;  %v2448_v22 = vmul.f32 -1.442695, %v3922_v7  ;;  %v1192_v23 = vpop.f32.mrb[23].mxu1  ;;  %v2058_v62 = vpop.f32.mrb[25].mxu0  ;;  %v2302_v31 = vmul.f32 %v3244_v21, %v3842_v54 }
 0x1a2   : > { %v3246_v27 = vpop.eup %3245  ;;  %3265 = vrcp.f32 %v2212_v20  ;;  %v2447_v32 = vmul.f32 -1.442695, %v3924_v19  ;;  %v3047_v11 = vadd.f32 %v3812_v25, %v1192_v23  ;;  %v3934_v42 = vadd.f32 %v3045_v9, %v2964_v15 }
 0x1a3   : > { %v3248_v37 = vpop.eup %3247  ;;  %v2305_v38 = vmul.f32 %v3246_v27, %v3848_v34  ;;  %3267 = vpow2.f32 %v2445_v29  ;;  %2335 = vst.msk [vmem:[%s3875_s27 + $0x30] sm:$0xff] %vm2328_vm1, %v2302_v31  ;;  %v2811_v54 = vpop.f32.mrb[24].mxu1 }
 0x1a4   : > { %v3250_v43 = vpop.eup %3249  ;;  %v2215_v46 = vadd.f32 1.0, %v3248_v37  ;;  %3269 = vpow2.f32 %v2448_v22  ;;  %v3938_v51 = vadd.f32 %v3047_v11, %v2046_v30  ;;  %v2970_v12 = vpop.f32.mrb[26].mxu0  ;;  %v2450_v34 = vmul.f32 -1.442695, %v3934_v42 }
 0x1a5   : > { %v3252_v16 = vpop.eup %3251  ;;  %2338 = vst.msk [vmem:[%s3875_s27 + $0x48] sm:$0xff] %vm2328_vm1, %v2305_v38  ;;  %v2214_v24 = vadd.f32 1.0, %v3250_v43  ;;  %3271 = vpow2.f32 %v2447_v32  ;;  %v3049_v26 = vadd.f32 %v2811_v54, %v3812_v25  ;;  %v1206_v48 = vpop.f32.mrb[25].mxu1 }
 0x1a6   : > { %v2070_v14 = vpop.f32.mrb[27].mxu0  ;;  %v3254_v49 = vpop.eup %3253  ;;  %v2304_v58 = vmul.f32 %v3252_v16, %v3850_v36  ;;  %3273 = vrcp.f32 %v2215_v46  ;;  %v2449_v13 = vmul.f32 -1.442695, %v3938_v51  ;;  %v3051_v39 = vadd.f32 %v3812_v25, %v1206_v48 }
 0x1a7   : > { %v3256_v44 = vpop.eup %3255  ;;  %v2307_v50 = vmul.f32 %v3254_v49, %v3856_v41  ;;  %3275 = vrcp.f32 %v2214_v24  ;;  %v3948_v63 = vadd.f32 %v3049_v26, %v2967_v4  ;;  %v2814_v36 = vpop.f32.mrb[26].mxu1 }
 0x1a8   : > { %v3258_v8 = vpop.eup %3257  ;;  %2337 = vst.msk [vmem:[%s3875_s27 + $0x40] sm:$0xff] %vm2328_vm1, %v2304_v58  ;;  %v2217_v59 = vadd.f32 1.0, %v3256_v44  ;;  %3277 = vpow2.f32 %v2450_v34  ;;  %v3952_v53 = vadd.f32 %v3051_v39, %v2058_v62  ;;  %v2973_v57 = vpop.f32.mrb[28].mxu0  ;;  %v3053_v60 = vadd.f32 %v2814_v36, %v3812_v25 }
 0x1a9   : > { %v3260_v15 = vpop.eup %3259  ;;  %2340 = vst.msk [vmem:[%s3875_s27 + $0x58] sm:$0xff] %vm2328_vm1, %v2307_v50  ;;  %v2216_v5 = vadd.f32 1.0, %v3258_v8  ;;  %3279 = vpow2.f32 %v2449_v13  ;;  %v2452_v41 = vmul.f32 -1.442695, %v3948_v63  ;;  %v1220_v61 = vpop.f32.mrb[27].mxu1 }
 0x1aa   : > { %v2082_v6 = vpop.f32.mrb[29].mxu0  ;;  %v3262_v35 = vpop.eup %3261  ;;  %v2306_v30 = vmul.f32 %v3260_v15, %v3858_v47  ;;  %3281 = vrcp.f32 %v2217_v59  ;;  %v2451_v56 = vmul.f32 -1.442695, %v3952_v53  ;;  %v3055_v17 = vadd.f32 %v3812_v25, %v1220_v61 }
 0x1ab   : > { %v3264_v1 = vpop.eup %3263  ;;  %v2309_v0 = vmul.f32 %v3262_v35, %v3864_v3  ;;  %3283 = vrcp.f32 %v2216_v5  ;;  %v3962_v40 = vadd.f32 %v3053_v60, %v2970_v12  ;;  %v2817_v47 = vpop.f32.mrb[28].mxu1 }
 0x1ac   : > { %v3266_v29 = vpop.eup %3265  ;;  %2339 = vst.msk [vmem:[%s3875_s27 + $0x50] sm:$0xff] %vm2328_vm1, %v2306_v30  ;;  %v2219_v20 = vadd.f32 1.0, %v3264_v1  ;;  %3285 = vpow2.f32 %v2452_v41  ;;  %v3966_v28 = vadd.f32 %v3055_v17, %v2070_v14  ;;  %v2976_v4 = vpop.f32.mrb[30].mxu0  ;;  %v3057_v9 = vadd.f32 %v2817_v47, %v3812_v25 }
 0x1ad   : > { %v3268_v21 = vpop.eup %3267  ;;  %2342 = vst.msk [vmem:[%s3875_s27 + $0x68] sm:$0xff] %vm2328_vm1, %v2309_v0  ;;  %v2308_v22 = vmul.f32 %v3266_v29, %v3866_v52  ;;  %3287 = vpow2.f32 %v2451_v56  ;;  %v2454_v3 = vmul.f32 -1.442695, %v3962_v40  ;;  %v1234_v23 = vpop.f32.mrb[29].mxu1 }
 0x1ae   : > { %v2094_v62 = vpop.f32.mrb[31].mxu0  ;;  %v3270_v27 = vpop.eup %3269  ;;  %3289 = vrcp.f32 %v2219_v20  ;;  %v2218_v31 = vadd.f32 1.0, %v3268_v21  ;;  %v3059_v32 = vadd.f32 %v3812_v25, %v1234_v23  ;;  %v2453_v38 = vmul.f32 -1.442695, %v3966_v28 }
 0x1af   : > { %v3272_v11 = vpop.eup %3271  ;;  %2341 = vst.msk [vmem:[%s3875_s27 + $0x60] sm:$0xff] %vm2328_vm1, %v2308_v22  ;;  %v2221_v37 = vadd.f32 1.0, %v3270_v27  ;;  %3291 = vpow2.f32 %v2454_v3  ;;  %v3977_v52 = vadd.f32 %v3057_v9, %v2973_v57  ;;  %v2820_v12 = vpop.f32.mrb[30].mxu1 }
 0x1b0   : > { %v3274_v43 = vpop.eup %3273  ;;  %3293 = vrcp.f32 %v2218_v31  ;;  %v2220_v46 = vadd.f32 1.0, %v3272_v11  ;;  %v3979_v54 = vadd.f32 %v3059_v32, %v2082_v6  ;;  %v3061_v26 = vadd.f32 %v2820_v12, %v3812_v25  ;;  %v1248_v48 = vpop.f32.mrb[31].mxu1 }
 0x1b1   : > { %v3276_v16 = vpop.eup %3275  ;;  %v2311_v24 = vmul.f32 %v3274_v43, %v3880_v2  ;;  %3295 = vrcp.f32 %v2221_v37  ;;  %v2456_v34 = vmul.f32 -1.442695, %v3977_v52  ;;  %v3063_v58 = vadd.f32 %v3812_v25, %v1248_v48 }
 0x1b2   : > { %v3278_v14 = vpop.eup %3277  ;;  %v2310_v49 = vmul.f32 %v3276_v16, %v3883_v18  ;;  %3297 = vrcp.f32 %v2220_v46  ;;  %v2455_v2 = vmul.f32 -1.442695, %v3979_v54  ;;  %v3989_v44 = vadd.f32 %v3061_v26, %v2976_v4 }
 0x1b3   : > { %v3280_v13 = vpop.eup %3279  ;;  %2344 = vst.msk [vmem:[%s3875_s27 + $0x78] sm:$0xff] %vm2328_vm1, %v2311_v24  ;;  %v2223_v39 = vadd.f32 1.0, %v3278_v14  ;;  %3299 = vpow2.f32 %v2453_v38  ;;  %v3993_v18 = vadd.f32 %v3063_v58, %v2094_v62 }
 0x1b4   : > { %v3282_v50 = vpop.eup %3281  ;;  %2343 = vst.msk [vmem:[%s3875_s27 + $0x70] sm:$0xff] %vm2328_vm1, %v2310_v49  ;;  %v2222_v8 = vadd.f32 1.0, %v3280_v13  ;;  %3301 = vpow2.f32 %v2456_v34  ;;  %v2458_v36 = vmul.f32 -1.442695, %v3989_v44 }
 0x1b5   : > { %v3284_v59 = vpop.eup %3283  ;;  %v2313_v25 = vmul.f32 %v3282_v50, %v3894_v45  ;;  %3303 = vrcp.f32 %v2223_v39  ;;  %v2457_v60 = vmul.f32 -1.442695, %v3993_v18 }
 0x1b6   : > { %v3286_v57 = vpop.eup %3285  ;;  %v2312_v15 = vmul.f32 %v3284_v59, %v3897_v55  ;;  %3305 = vrcp.f32 %v2222_v8 }
 0x1b7   : > { %v3288_v5 = vpop.eup %3287  ;;  %2346 = vst.msk [vmem:[%s3875_s27 + $0x88] sm:$0xff] %vm2328_vm1, %v2313_v25  ;;  %v2225_v41 = vadd.f32 1.0, %v3286_v57  ;;  %3307 = vpow2.f32 %v2455_v2 }
 0x1b8   : > { %v3290_v61 = vpop.eup %3289  ;;  %2345 = vst.msk [vmem:[%s3875_s27 + $0x80] sm:$0xff] %vm2328_vm1, %v2312_v15  ;;  %v2224_v6 = vadd.f32 1.0, %v3288_v5  ;;  %3309 = vpow2.f32 %v2458_v36 }
 0x1b9   : > { %v3292_v45 = vpop.eup %3291  ;;  %v2315_v35 = vmul.f32 %v3290_v61, %v3908_v33  ;;  %3311 = vrcp.f32 %v2225_v41 }
 0x1ba   : > { %v3294_v55 = vpop.eup %3293  ;;  %3313 = vrcp.f32 %v2224_v6  ;;  %v2227_v30 = vadd.f32 1.0, %v3292_v45 }
 0x1bb   : > { %v3296_v56 = vpop.eup %3295  ;;  %2348 = vst.msk [vmem:[%s3875_s27 + $0x98] sm:$0xff] %vm2328_vm1, %v2315_v35  ;;  %v2314_v17 = vmul.f32 %v3294_v55, %v3911_v10  ;;  %3315 = vpow2.f32 %v2457_v60 }
 0x1bc   : > { %v3298_v1 = vpop.eup %3297  ;;  %v2317_v0 = vmul.f32 %v3296_v56, %v3922_v7  ;;  %3317 = vrcp.f32 %v2227_v30 }
 0x1bd   : > { %v3300_v29 = vpop.eup %3299  ;;  %2347 = vst.msk [vmem:[%s3875_s27 + $0x90] sm:$0xff] %vm2328_vm1, %v2314_v17  ;;  %v2316_v33 = vmul.f32 %v3298_v1, %v3924_v19 }
 0x1be   : > { %v3302_v20 = vpop.eup %3301  ;;  %2350 = vst.msk [vmem:[%s3875_s27 + $0xa8] sm:$0xff] %vm2328_vm1, %v2317_v0  ;;  %v2226_v47 = vadd.f32 1.0, %v3300_v29 }
 0x1bf   : > { %v3304_v4 = vpop.eup %3303  ;;  %2349 = vst.msk [vmem:[%s3875_s27 + $0xa0] sm:$0xff] %vm2328_vm1, %v2316_v33  ;;  %v2229_v10 = vadd.f32 1.0, %v3302_v20 }
 0x1c0   : > { %v3306_v21 = vpop.eup %3305  ;;  %v2319_v22 = vmul.f32 %v3304_v4, %v3934_v42  ;;  %3319 = vrcp.f32 %v2226_v47 }
 0x1c1   : > { %v3308_v7 = vpop.eup %3307  ;;  %v2318_v3 = vmul.f32 %v3306_v21, %v3938_v51  ;;  %3321 = vrcp.f32 %v2229_v10 }
 0x1c2   : > { %v3310_v19 = vpop.eup %3309  ;;  %2352 = vst.msk [vmem:[%s3875_s27 + $0xb8] sm:$0xff] %vm2328_vm1, %v2319_v22  ;;  %v2228_v9 = vadd.f32 1.0, %v3308_v7 }
 0x1c3   : > { %v3312_v23 = vpop.eup %3311  ;;  %2351 = vst.msk [vmem:[%s3875_s27 + $0xb0] sm:$0xff] %vm2328_vm1, %v2318_v3  ;;  %v2231_v62 = vadd.f32 1.0, %v3310_v19 }
 0x1c4   : > { %v3314_v27 = vpop.eup %3313  ;;  %v2321_v31 = vmul.f32 %v3312_v23, %v3948_v63  ;;  %3323 = vrcp.f32 %v2228_v9 }
 0x1c5   : > { %v3316_v42 = vpop.eup %3315  ;;  %v2320_v51 = vmul.f32 %v3314_v27, %v3952_v53  ;;  %3325 = vrcp.f32 %v2231_v62 }
 0x1c6   : > { %v3318_v32 = vpop.eup %3317  ;;  %2354 = vst.msk [vmem:[%s3875_s27 + $0xc8] sm:$0xff] %vm2328_vm1, %v2321_v31  ;;  %v2230_v11 = vadd.f32 1.0, %v3316_v42 }
 0x1c7   : > { %2353 = vst.msk [vmem:[%s3875_s27 + $0xc0] sm:$0xff] %vm2328_vm1, %v2320_v51  ;;  %v2323_v37 = vmul.f32 %v3318_v32, %v3962_v40 }
 0x1c8   : > { %3327 = vrcp.f32 %v2230_v11 }
 0x1c9   : > { %2356 = vst.msk [vmem:[%s3875_s27 + $0xd8] sm:$0xff] %vm2328_vm1, %v2323_v37 }
 0x1ca   : > { %v3320_v63 = vpop.eup %3319 }
 0x1cb   : > { %v3322_v38 = vpop.eup %3321  ;;  %v2322_v43 = vmul.f32 %v3320_v63, %v3966_v28 }
 0x1cc   : > { %v2325_v53 = vmul.f32 %v3322_v38, %v3977_v52 }
 0x1cd   : > { %2355 = vst.msk [vmem:[%s3875_s27 + $0xd0] sm:$0xff] %vm2328_vm1, %v2322_v43 }
 0x1ce   : > { %v3324_v46 = vpop.eup %3323  ;;  %2358 = vst.msk [vmem:[%s3875_s27 + $0xe8] sm:$0xff] %vm2328_vm1, %v2325_v53 }
 0x1cf   : > { %v3326_v12 = vpop.eup %3325  ;;  %v2324_v16 = vmul.f32 %v3324_v46, %v3979_v54 }
 0x1d0   : > { %v2327_v40 = vmul.f32 %v3326_v12, %v3989_v44 }
 0x1d1   : > { %2357 = vst.msk [vmem:[%s3875_s27 + $0xe0] sm:$0xff] %vm2328_vm1, %v2324_v16 }
 0x1d2   : > { %v3328_v24 = vpop.eup %3327  ;;  %2360 = vst.msk [vmem:[%s3875_s27 + $0xf8] sm:$0xff] %vm2328_vm1, %v2327_v40 }
 0x1d3   : > { %v2326_v34 = vmul.f32 %v3328_v24, %v3993_v18 }
 0x1d5   : > { %2359 = vst.msk [vmem:[%s3875_s27 + $0xf0] sm:$0xff] %vm2328_vm1, %v2326_v34 }
 0x1d6 PF: > { %s13_s12 = sadd.s32 1, %s3335_s12  }
 0x1d7   : > { %p10_p4 = scmp.ge.s32.totalorder %s13_s12, 4  }
 0x1d9   :  { %12 = sbr.rel (!%p10_p4) target bundleno = 1 (0x1), region = 62 }

</bundles_post_ra>
